<compile_context>
chip_gen: v7x
topology: tpu7x:2x2x1
jax: 0.10.0
libtpu: 0.0.40
codegen_flags: <defaults>
</compile_context>

<pallas_src>
import functools
import math

import jax
import jax.numpy as jnp
from jax import lax
from jax.experimental import pallas as pl
from jax.experimental.pallas import tpu as pltpu


def _cdiv(a, b):
    return -(-a // b)


def _layer_norm_kernel(x_ref, scale_ref, shift_ref, o_ref, *, inv_d, eps):
    """Standard path (full feature dim per row lives in one block)."""
    x = x_ref[...].astype(jnp.float32)                       # (br, D)
    s = jnp.sum(x, axis=-1, keepdims=True)                   # XLU reduce
    ss = jnp.sum(x * x, axis=-1, keepdims=True)              # same pass
    mean = s * jnp.float32(inv_d)
    var = jnp.maximum(ss * jnp.float32(inv_d) - mean * mean, 0.0)
    inv = lax.rsqrt(var + jnp.float32(eps))                  # EUP rsqrt
    scale = scale_ref[...].astype(jnp.float32)
    shift = shift_ref[...].astype(jnp.float32)
    o_ref[...] = ((x - mean) * inv * scale + shift).astype(o_ref.dtype)


def _layer_norm_packed_kernel(x_ref, scale_ref, shift_ref, seg_ref, o_ref, *,
                              d, inv_d, eps):
    """Lane-packed path for D < 128: each kernel row holds k = 128 // D
    original rows side by side (lane-dense stores).  Per-segment sums are
    computed via a block-diagonal ones matmul on the MXU; the result is
    already broadcast across each segment's lanes."""
    del d
    x = x_ref[...].astype(jnp.float32)                        # (br, k*D)
    seg = seg_ref[...]                                        # (k*D, k*D) 0/1 block-diag, f32
    s = jnp.dot(x, seg, preferred_element_type=jnp.float32,
                precision=lax.Precision.HIGHEST)
    ss = jnp.dot(x * x, seg, preferred_element_type=jnp.float32,
                 precision=lax.Precision.HIGHEST)
    mean = s * jnp.float32(inv_d)
    var = jnp.maximum(ss * jnp.float32(inv_d) - mean * mean, 0.0)
    inv = lax.rsqrt(var + jnp.float32(eps))
    scale = scale_ref[...].astype(jnp.float32)                # scale tiled k times
    shift = shift_ref[...].astype(jnp.float32)
    o_ref[...] = ((x - mean) * inv * scale + shift).astype(o_ref.dtype)


def layer_norm_pallas(x, scale, shift, *, eps=1e-5, target_block_bytes=4 << 20):
    """LayerNorm over the last dim of x, matching the PyTorch module exactly."""
    orig_shape = x.shape
    D = orig_shape[-1]
    rows = math.prod(orig_shape[:-1]) if len(orig_shape) > 1 else 1

    # ---- lane packing for narrow feature dims (D < 128) --------------------
    LANES = 128
    pack = 1
    if D < LANES and LANES % D == 0:
        k = LANES // D
        if rows % k == 0 and k <= 64:
            pack = k
    dl = D * pack                  # lane width presented to the kernel
    rows_p = rows // pack

    x2d = x.reshape(rows_p, dl)
    if pack > 1:
        scale2d = jnp.tile(scale.reshape(1, D), (1, pack))
        shift2d = jnp.tile(shift.reshape(1, D), (1, pack))
    else:
        scale2d = scale.reshape(1, D)
        shift2d = shift.reshape(1, D)

    # ---- block sizing -------------------------------------------------------
    itemsize = x.dtype.itemsize
    bytes_per_row = dl * itemsize
    br = max(1, target_block_bytes // bytes_per_row)
    br = max(8, (br // 8) * 8)                      # sublane-aligned

    total_bytes = rows_p * bytes_per_row
    if total_bytes >= (2 << 20) and rows_p >= 16:
        # Never collapse to a single grid step for mid-sized inputs: keep >= 2
        # steps so DMA/compute overlap and the parallel axis can use both v7x
        # TensorCores.
        br = min(br, 8 * _cdiv(_cdiv(rows_p, 2), 8))

    if br >= rows_p:
        br = rows_p                                 # full-extent block
        grid = (1,)
    else:
        grid = (_cdiv(rows_p, br),)                 # partial last block -> masked store

    # ---- VMEM budget: 2x in + 2x out (double-buffered, I/O dtype) plus ~3
    # block-sized f32 temporaries (upcast, products, pre-downcast result),
    # params / seg matrix, and a few MiB headroom.  Clamp to 48 MiB so it is
    # safe on v7x (64 MiB physical), floor at 16 MiB for v5e. -----------------
    blk_io = br * dl * itemsize
    blk_f32 = br * dl * 4
    small = 2 * dl * 4 + (dl * dl * 4 if pack > 1 else 0)
    vmem_limit = 4 * blk_io + 3 * blk_f32 + small + (4 << 20)
    vmem_limit = int(min(max(vmem_limit, 16 << 20), 48 << 20))

    common = dict(
        out_shape=jax.ShapeDtypeStruct((rows_p, dl), x.dtype),
        compiler_params=pltpu.CompilerParams(
            dimension_semantics=("parallel",),
            vmem_limit_bytes=vmem_limit,
        ),
    )

    if pack > 1:
        lane = jnp.arange(dl, dtype=jnp.int32)
        seg = (lane[:, None] // D == lane[None, :] // D).astype(jnp.float32)
        out2d = pl.pallas_call(
            functools.partial(_layer_norm_packed_kernel,
                              d=D, inv_d=1.0 / D, eps=eps),
            grid_spec=pltpu.PrefetchScalarGridSpec(
                num_scalar_prefetch=0,
                grid=grid,
                in_specs=[
                    pl.BlockSpec((br, dl), lambda i: (i, 0)),
                    pl.BlockSpec((1, dl), lambda i: (0, 0)),
                    pl.BlockSpec((1, dl), lambda i: (0, 0)),
                    pl.BlockSpec((dl, dl), lambda i: (0, 0)),
                ],
                out_specs=pl.BlockSpec((br, dl), lambda i: (i, 0)),
            ),
            **common,
        )(x2d, scale2d, shift2d, seg)
    else:
        out2d = pl.pallas_call(
            functools.partial(_layer_norm_kernel, inv_d=1.0 / D, eps=eps),
            grid_spec=pltpu.PrefetchScalarGridSpec(
                num_scalar_prefetch=0,
                grid=grid,
                in_specs=[
                    pl.BlockSpec((br, dl), lambda i: (i, 0)),
                    pl.BlockSpec((1, dl), lambda i: (0, 0)),
                    pl.BlockSpec((1, dl), lambda i: (0, 0)),
                ],
                out_specs=pl.BlockSpec((br, dl), lambda i: (i, 0)),
            ),
            **common,
        )(x2d, scale2d, shift2d)

    return out2d.reshape(orig_shape)


def layer_norm_ref(x, scale, shift, eps=1e-5):
    # Pure-JAX reference mirroring the PyTorch forward exactly.
    mean = jnp.mean(x, axis=-1, keepdims=True)
    var = jnp.mean((x - mean) ** 2, axis=-1, keepdims=True)  # unbiased=False
    norm = (x - mean) / jnp.sqrt(var + eps)
    return scale * norm + shift


def _check(x, scale, shift, **kwargs):
    y = jax.block_until_ready(layer_norm_pallas(x, scale, shift, **kwargs))
    y_ref = layer_norm_ref(x, scale, shift)
    assert y.shape == x.shape and y.dtype == x.dtype
    assert jnp.allclose(y, y_ref, atol=1e-4, rtol=1e-4), "mismatch vs reference"
    return y


if __name__ == "__main__":
    key = jax.random.PRNGKey(0)
    kx, ks, kb, kx2, ks2, kb2, kx3 = jax.random.split(key, 7)

    # Case 1: module-consistent shapes (batch=2, seq=8, emb_dim=32) — exercises
    # the lane-packed (D < 128) path.
    emb_dim = 32
    x = jax.random.normal(kx, (2, 8, emb_dim), dtype=jnp.float32)
    scale = 1.0 + 0.1 * jax.random.normal(ks, (emb_dim,), dtype=jnp.float32)
    shift = 0.1 * jax.random.normal(kb, (emb_dim,), dtype=jnp.float32)
    _check(x, scale, shift)

    # Case 2: D >= 128 — exercises the standard single-pass path.
    emb2 = 256
    x2 = jax.random.normal(kx2, (2, 8, emb2), dtype=jnp.float32)
    scale2 = 1.0 + 0.1 * jax.random.normal(ks2, (emb2,), dtype=jnp.float32)
    shift2 = 0.1 * jax.random.normal(kb2, (emb2,), dtype=jnp.float32)
    _check(x2, scale2, shift2)

    # Case 3: tiny block target to exercise a multi-step grid with a masked
    # partial last block (68 rows, 8-row blocks -> 9 grid steps).
    x3 = jax.random.normal(kx3, (68, emb2), dtype=jnp.float32)
    _check(x3, scale2, shift2, target_block_bytes=8 << 10)

    print("KERNEL_OK")
</pallas_src>

<mosaic_0001>
module attributes {stable_mosaic.version = 11 : i64} {
  func.func @_layer_norm_packed_kernel(%arg0: i32, %arg1: memref<4x128xf32, #tpu.memory_space<vmem>>, %arg2: memref<1x128xf32, #tpu.memory_space<vmem>>, %arg3: memref<1x128xf32, #tpu.memory_space<vmem>>, %arg4: memref<128x128xf32, #tpu.memory_space<vmem>>, %arg5: memref<4x128xf32, #tpu.memory_space<vmem>>) attributes {dimension_semantics = [#tpu.dimension_semantics<parallel>], iteration_bounds = array<i64: 1>, scalar_prefetch = 0 : i64, scratch_operands = 0 : i64, tpu.core_type = #tpu.core_type<tc>, window_params = [{transform_indices = @transform_0, window_bounds = array<i64: 4, 128>}, {pipeline_mode = #tpu.pipeline_mode<synchronous>, transform_indices = @transform_1, window_bounds = array<i64: 1, 128>}, {pipeline_mode = #tpu.pipeline_mode<synchronous>, transform_indices = @transform_2, window_bounds = array<i64: 1, 128>}, {pipeline_mode = #tpu.pipeline_mode<synchronous>, transform_indices = @transform_3, window_bounds = array<i64: 128, 128>}, {transform_indices = @transform_4, window_bounds = array<i64: 4, 128>}]} {
    %c0 = arith.constant 0 : index
    %c0_0 = arith.constant 0 : index
    %0 = vector.load %arg1[%c0, %c0_0] : memref<4x128xf32, #tpu.memory_space<vmem>>, vector<4x128xf32>
    %c0_1 = arith.constant 0 : index
    %c0_2 = arith.constant 0 : index
    %1 = vector.load %arg4[%c0_1, %c0_2] : memref<128x128xf32, #tpu.memory_space<vmem>>, vector<128x128xf32>
    %cst = arith.constant dense<0.000000e+00> : vector<4x128xf32>
    %2 = tpu.matmul %0, %1, %cst {dimension_numbers = #tpu.dot_dimension_numbers<[1], [0], [0], [1], [0, 0, 1, 1], [], []>, precision = #tpu.contract_precision<fp32>} : vector<4x128xf32>, vector<128x128xf32>, vector<4x128xf32> -> vector<4x128xf32>
    %3 = arith.mulf %0, %0 : vector<4x128xf32>
    %cst_3 = arith.constant dense<0.000000e+00> : vector<4x128xf32>
    %4 = tpu.matmul %3, %1, %cst_3 {dimension_numbers = #tpu.dot_dimension_numbers<[1], [0], [0], [1], [0, 0, 1, 1], [], []>, precision = #tpu.contract_precision<fp32>} : vector<4x128xf32>, vector<128x128xf32>, vector<4x128xf32> -> vector<4x128xf32>
    %cst_4 = arith.constant 3.125000e-02 : f32
    %5 = vector.broadcast %cst_4 : f32 to vector<4x128xf32>
    %6 = arith.mulf %2, %5 : vector<4x128xf32>
    %cst_5 = arith.constant 3.125000e-02 : f32
    %7 = vector.broadcast %cst_5 : f32 to vector<4x128xf32>
    %8 = arith.mulf %4, %7 : vector<4x128xf32>
    %9 = arith.mulf %6, %6 : vector<4x128xf32>
    %10 = arith.subf %8, %9 : vector<4x128xf32>
    %cst_6 = arith.constant 0.000000e+00 : f32
    %11 = vector.broadcast %cst_6 : f32 to vector<4x128xf32>
    %12 = arith.maximumf %10, %11 : vector<4x128xf32>
    %cst_7 = arith.constant 9.99999974E-6 : f32
    %13 = vector.broadcast %cst_7 : f32 to vector<4x128xf32>
    %14 = arith.addf %12, %13 : vector<4x128xf32>
    %15 = math.rsqrt %14 : vector<4x128xf32>
    %c0_8 = arith.constant 0 : index
    %c0_9 = arith.constant 0 : index
    %16 = vector.load %arg2[%c0_8, %c0_9] : memref<1x128xf32, #tpu.memory_space<vmem>>, vector<1x128xf32>
    %c0_10 = arith.constant 0 : index
    %c0_11 = arith.constant 0 : index
    %17 = vector.load %arg3[%c0_10, %c0_11] : memref<1x128xf32, #tpu.memory_space<vmem>>, vector<1x128xf32>
    %18 = arith.subf %0, %6 : vector<4x128xf32>
    %19 = arith.mulf %18, %15 : vector<4x128xf32>
    %20 = vector.broadcast %16 : vector<1x128xf32> to vector<4x128xf32>
    %21 = arith.mulf %19, %20 : vector<4x128xf32>
    %22 = vector.broadcast %17 : vector<1x128xf32> to vector<4x128xf32>
    %23 = arith.addf %21, %22 : vector<4x128xf32>
    %c0_12 = arith.constant 0 : index
    %c0_13 = arith.constant 0 : index
    %24 = vector.load %arg5[%c0_12, %c0_13] : memref<4x128xf32, #tpu.memory_space<vmem>>, vector<4x128xf32>
    tpu.vector_store %arg5[%c0_12, %c0_13], %23 {strides = array<i32>} : memref<4x128xf32, #tpu.memory_space<vmem>>, vector<4x128xf32>,
    return
  }
  func.func @transform_0(%arg0: i32) -> (i32, i32) {
    %c0_i32 = arith.constant 0 : i32
    %c0_i32_0 = arith.constant 0 : i32
    return %arg0, %c0_i32 : i32, i32
  }
  func.func @transform_1(%arg0: i32) -> (i32, i32) {
    %c0_i32 = arith.constant 0 : i32
    %c0_i32_0 = arith.constant 0 : i32
    %c0_i32_1 = arith.constant 0 : i32
    return %c0_i32, %c0_i32_0 : i32, i32
  }
  func.func @transform_2(%arg0: i32) -> (i32, i32) {
    %c0_i32 = arith.constant 0 : i32
    %c0_i32_0 = arith.constant 0 : i32
    %c0_i32_1 = arith.constant 0 : i32
    return %c0_i32, %c0_i32_0 : i32, i32
  }
  func.func @transform_3(%arg0: i32) -> (i32, i32) {
    %c0_i32 = arith.constant 0 : i32
    %c0_i32_0 = arith.constant 0 : i32
    %c0_i32_1 = arith.constant 0 : i32
    return %c0_i32, %c0_i32_0 : i32, i32
  }
  func.func @transform_4(%arg0: i32) -> (i32, i32) {
    %c0_i32 = arith.constant 0 : i32
    %c0_i32_0 = arith.constant 0 : i32
    return %arg0, %c0_i32 : i32, i32
  }
}

</mosaic_0001>

<bundles_post_ra>
// kernel: tpu_custom_call.1
= control target key start
LH: loop header
LB: loop body
LE: loop exit
PB: predicated region body
PF: predicated region fallthrough
CT: control target
= control target key end

     0   :  { %9 = vsyncpa [#allocation3], 0  ;;  %s2844_s0 = inlined_call_operand.hbm [shape: f32[4,128], index: 0, kind: input, shape index: {}]   ;;  %s2845_s1 = inlined_call_operand.vmem [shape: f32[1,128], index: 1, kind: input, shape index: {}]   ;;  %s2846_s2 = inlined_call_operand.vmem [shape: f32[1,128], index: 2, kind: input, shape index: {}]   ;;  %s2847_s3 = inlined_call_operand.hbm [shape: f32[128,128], index: 3, kind: input, shape index: {}]   ;;  %s2848_s4 = inlined_call_operand.hbm [shape: f32[4,128], index: 4, kind: output, shape index: {}]  }
   0x1   :  { %10 = vsyncpa [#allocation6], 0 }
   0x2   :  { %11 = vsyncpa [#allocation4], 0  ;;  %s2402_s15 = smov [#allocation2]   ;;  %s2403_s17 = smov [#allocation5]  }
   0x3   :  { %s18_s16 = sshll.u32 %s2402_s15, 4  ;;  %s31_s18 = sshll.u32 %s2403_s17, 4  ;;  %s19_s16 = int_to_ptr.vmem [resolvable:$true] %s18_s16  ;;  %s2435_s18 = int_to_ptr.vmem [resolvable:$true] %s31_s18 }
   0x4   :  { %s2330_s21 = scalar_lea.hbm %s2844_s0, 64 }
   0x5   :  { %p2331_p0 = scmp.ne.s32.totalorder %s2844_s0, %s2330_s21  ;;  %p2334_p1 = scmp.lt.u32.totalorder %s2330_s21, %s2844_s0 }
   0x7   :  { %p2336_p2 = pnand %p2334_p1, %p2331_p0 }
   0x9   :  { %2339 = shalt.err (!%p2336_p2)
}
   0xa   :  { %s2340_s26 = scalar_lea.vmem %s19_s16, 64  ;;  %p2345_p4 = scmp.lt.s32.totalorder %s19_s16, %s19_s16 }
   0xb   :  { %p2341_p3 = scmp.ne.s32.totalorder %s19_s16, %s2340_s26  ;;  %p2346_p5 = scmp.lt.s32.totalorder %s2340_s26, %s2340_s26 }
   0xd   :  { %p2347_p6 = por %p2346_p5, %p2345_p4 }
   0xf   :  { %p2348_p7 = pnand %p2347_p6, %p2341_p3 }
  0x11   :  { %2351 = shalt.err (!%p2348_p7)
}
  0x12   :  { %21 = dma.hbm_to_vmem [thread:$0]  %s2844_s0, 64, %s19_s16, [#allocation3]  }
  0x13   :  { %s2352_s5 = scalar_lea.hbm %s2847_s3, 2048 }
  0x14   :  { %p2353_p8 = scmp.ne.s32.totalorder %s2847_s3, %s2352_s5  ;;  %p2356_p9 = scmp.lt.u32.totalorder %s2352_s5, %s2847_s3 }
  0x16   :  { %p2358_p10 = pnand %p2356_p9, %p2353_p8 }
  0x18   :  { %2361 = shalt.err (!%p2358_p10)
}
  0x19   :  { %s2362_s10 = scalar_lea.vmem %s2435_s18, 2048  ;;  %p2367_p12 = scmp.lt.s32.totalorder %s2435_s18, %s2435_s18 }
  0x1a   :  { %p2363_p11 = scmp.ne.s32.totalorder %s2435_s18, %s2362_s10  ;;  %p2368_p13 = scmp.lt.s32.totalorder %s2362_s10, %s2362_s10 }
  0x1c   :  { %p2369_p0 = por %p2368_p13, %p2367_p12 }
  0x1e   :  { %p2370_p1 = pnand %p2369_p0, %p2363_p11 }
  0x20   :  { %2373 = shalt.err (!%p2370_p1)
}
  0x21   :  { %s2404_s0 = smov 128   ;;  %s2405_s11 = smov 8  }
  0x22   :  { %37 = dma.hbm_to_vmem [thread:$0]  %s2847_s3, 2048, %s2435_s18, [#allocation6], %s2404_s0, %s2404_s0, %s2405_s11  }
  0x23   :  { %2396 = dma.done.wait [#allocation3], 64  }
  0x24   :  { %2397 = vsyncadd [#allocation3], 4294967232 }
  0x25   :  { %2398 = dma.done.wait [#allocation6], 2048  }
  0x26   :  { %2399 = vsyncadd [#allocation6], 4294965248  ;;  %v2406_v0 = vmov 0.0|0.0   ;;  %vm2407_vm0 = vmmov 0   ;;  %v2408_v1 = vmov 0.0   ;;  %v45_v2 = vld [vmem:[#allocation5] sm:$0xff] }
  0x27   :  { %2012 = vmatprep.subr.bf16.mxu0 %v2406_v0  ;;  %2156 = vmatprep.subr.bf16.mxu1 %v2406_v0  ;;  %v46_v3 = vld [vmem:[#allocation5 + $0x8] sm:$0xff]  ;;  %v47_v4 = vld [vmem:[#allocation5 + $0x10] sm:$0xff]  ;;  %v62_v5 = vand.u32 4294901760, %v45_v2  ;;  %v48_v7 = vld [vmem:[#allocation5 + $0x18] sm:$0xff]  ;;  %s2409_s17 = smov [#allocation7]  }
  0x28   :  { %1624 = vmatprep.mubr.msk.f32.mxu0 %vm2407_vm0, %v2408_v1  ;;  %1834 = vmatprep.mubr.msk.f32.mxu1 %vm2407_vm0, %v2408_v1  ;;  %v65_v6 = vand.u32 4294901760, %v46_v3  ;;  %v68_v8 = vand.u32 4294901760, %v47_v4  ;;  %v71_v9 = vand.u32 4294901760, %v48_v7  ;;  %v2472_v10 = vld [vmem:[#allocation5 + $0x20] sm:$0xff]  ;;  %v2474_v11 = vld [vmem:[#allocation5 + $0x28] sm:$0xff]  ;;  %v2486_v16 = vld [vmem:[#allocation5 + $0x30] sm:$0xff] }
  0x29   :  { %v74_v14 = vand.u32 4294901760, %v2472_v10  ;;  %v77_v15 = vand.u32 4294901760, %v2474_v11  ;;  %v2488_v17 = vld [vmem:[#allocation5 + $0x38] sm:$0xff]  ;;  %v80_v20 = vand.u32 4294901760, %v2486_v16  ;;  %v53_v22 = vld [vmem:[#allocation5 + $0x40] sm:$0xff]  ;;  %v54_v23 = vld [vmem:[#allocation5 + $0x48] sm:$0xff]  ;;  %v2509_v35 = vsub.f32 %v45_v2, %v62_v5 }
  0x2a   :  { %v2476_v12 = vpack.c.bf16 %v65_v6, %v62_v5  ;;  %v2480_v13 = vpack.c.bf16 %v71_v9, %v68_v8  ;;  %v2490_v18 = vld [vmem:[#allocation2] sm:$0xf]  ;;  %v83_v21 = vand.u32 4294901760, %v2488_v17  ;;  %v55_v26 = vld [vmem:[#allocation5 + $0x50] sm:$0xff]  ;;  %v57_v28 = vld [vmem:[#allocation5 + $0x60] sm:$0xff]  ;;  %v86_v30 = vand.u32 4294901760, %v53_v22 }
  0x2b   :  { %v2494_v19 = vpack.c.bf16 %v77_v15, %v74_v14  ;;  %v2501_v24 = vand.u32 4294901760, %v2490_v18  ;;  %v702_v25 = vmul.f32 %v2490_v18, %v2490_v18  ;;  %v56_v27 = vld [vmem:[#allocation5 + $0x58] sm:$0xff]  ;;  %v89_v31 = vand.u32 4294901760, %v54_v23  ;;  %v58_v32 = vld [vmem:[#allocation5 + $0x68] sm:$0xff]  ;;  %v59_v33 = vld [vmem:[#allocation5 + $0x70] sm:$0xff]  ;;  %s1376_s18 = sshll.u32 %s2409_s17, 4  ;;  %s1377_s18 = int_to_ptr.vmem [resolvable:$true] %s1376_s18 }
  0x2c   :  { %2014 = vmatpush3.bf16.msra.mxu0 %v2476_v12  ;;  %2158 = vmatpush3.bf16.msra.mxu1 %v2476_v12  ;;  %v2507_v29 = vpack.c.bf16 %v83_v21, %v80_v20  ;;  %v60_v34 = vld [vmem:[#allocation5 + $0x78] sm:$0xff]  ;;  %v2517_v37 = vsub.f32 %v46_v3, %v65_v6  ;;  %v2519_v38 = vsub.f32 %v47_v4, %v68_v8  ;;  %v92_v39 = vand.u32 4294901760, %v55_v26  ;;  %s2374_s19 = scalar_lea.vmem %s1377_s18, 64  ;;  %p2379_p3 = scmp.lt.s32.totalorder %s1377_s18, %s1377_s18 }
  0x2d   :  { %2015 = vmatprep.subr.bf16.mxu0 %v2406_v0  ;;  %2159 = vmatprep.subr.bf16.mxu1 %v2406_v0  ;;  %v2515_v36 = vsub.f32 %v2490_v18, %v2501_v24  ;;  %v95_v40 = vand.u32 4294901760, %v56_v27  ;;  %v2521_v41 = vand.u32 4294901760, %v702_v25  ;;  %v98_v42 = vand.u32 4294901760, %v57_v28  ;;  %p2375_p2 = scmp.ne.s32.totalorder %s1377_s18, %s2374_s19  ;;  %p2380_p4 = scmp.lt.s32.totalorder %s2374_s19, %s2374_s19 }
  0x2e   :  { %v101_v43 = vand.u32 4294901760, %v58_v32  ;;  %v104_v44 = vand.u32 4294901760, %v59_v33  ;;  %v107_v45 = vand.u32 4294901760, %v60_v34  ;;  %v2525_v46 = vpack.c.bf16 %v89_v31, %v86_v30 }
  0x2f   :  { %v155_v47 = vand.u32 4294901760, %v2509_v35  ;;  %v2850_v48 = vand.u32 4294901760, %v2515_v36  ;;  %v162_v49 = vand.u32 4294901760, %v2517_v37  ;;  %v169_v50 = vand.u32 4294901760, %v2519_v38  ;;  %p2381_p5 = por %p2380_p4, %p2379_p3 }
  0x30   :  { %2017 = vmatpush3.bf16.msra.mxu0 %v2480_v13  ;;  %2161 = vmatpush3.bf16.msra.mxu1 %v2480_v13  ;;  %v2533_v51 = vsub.f32 %v48_v7, %v71_v9  ;;  %v2536_v52 = vsub.f32 %v702_v25, %v2521_v41  ;;  %v2538_v53 = vpack.c.bf16 %v95_v40, %v92_v39 }
  0x31   :  { %2018 = vmatprep.subr.bf16.mxu0 %v2406_v0  ;;  %2162 = vmatprep.subr.bf16.mxu1 %v2406_v0  ;;  %v2540_v54 = vpack.c.bf16 %v101_v43, %v98_v42  ;;  %v2542_v55 = vpack.c.bf16 %v107_v45, %v104_v44  ;;  %v156_v56 = vsub.f32 %v2509_v35, %v155_v47  ;;  %p2382_p6 = pnand %p2381_p5, %p2375_p2 }
  0x32   :  { %v2548_v57 = vsub.f32 %v2472_v10, %v74_v14  ;;  %v2551_v58 = vsub.f32 %v2474_v11, %v77_v15  ;;  %v145_v59 = vsub.f32 %v2515_v36, %v2850_v48  ;;  %v163_v60 = vsub.f32 %v2517_v37, %v162_v49 }
  0x33   :  { %v2560_v61 = vsub.f32 %v2519_v38, %v169_v50  ;;  %v176_v62 = vand.u32 4294901760, %v2533_v51  ;;  %v2849_v63 = vand.u32 4294901760, %v2536_v52  ;;  %v2565_v2 = vsub.f32 %v2486_v16, %v80_v20 }
  0x34   :  { %2020 = vmatpush3.bf16.msra.mxu0 %v2494_v19  ;;  %2164 = vmatpush3.bf16.msra.mxu1 %v2494_v19  ;;  %v2568_v3 = vsub.f32 %v2488_v17, %v83_v21  ;;  %v2570_v4 = vsub.f32 %v53_v22, %v86_v30  ;;  %v2572_v5 = vsub.f32 %v54_v23, %v89_v31  ;;  %v183_v9 = vand.u32 4294901760, %v2548_v57 }
  0x35   :  { %2021 = vmatprep.subr.bf16.mxu0 %v2406_v0  ;;  %2165 = vmatprep.subr.bf16.mxu1 %v2406_v0  ;;  %v2574_v6 = vsub.f32 %v55_v26, %v92_v39  ;;  %v2576_v7 = vsub.f32 %v56_v27, %v95_v40  ;;  %v2578_v8 = vsub.f32 %v57_v28, %v98_v42  ;;  %v157_v15 = vand.u32 4294901760, %v156_v56 }
  0x36   :  { %v2583_v10 = vsub.f32 %v58_v32, %v101_v43  ;;  %v2585_v11 = vsub.f32 %v59_v33, %v104_v44  ;;  %v2587_v14 = vsub.f32 %v60_v34, %v107_v45  ;;  %v164_v16 = vand.u32 4294901760, %v163_v60 }
  0x37   :  { %v177_v17 = vsub.f32 %v2533_v51, %v176_v62  ;;  %v190_v20 = vand.u32 4294901760, %v2551_v58  ;;  %v787_v21 = vsub.f32 %v2536_v52, %v2849_v63  ;;  %v197_v22 = vand.u32 4294901760, %v2565_v2 }
  0x38   :  { %2023 = vmatpush3.bf16.msra.mxu0 %v2507_v29  ;;  %2167 = vmatpush3.bf16.msra.mxu1 %v2507_v29  ;;  %v204_v23 = vand.u32 4294901760, %v2568_v3  ;;  %v211_v25 = vand.u32 4294901760, %v2570_v4  ;;  %v218_v26 = vand.u32 4294901760, %v2572_v5  ;;  %v225_v27 = vand.u32 4294901760, %v2574_v6 }
  0x39   :  { %2024 = vmatprep.subr.bf16.mxu0 %v2406_v0  ;;  %2168 = vmatprep.subr.bf16.mxu1 %v2406_v0  ;;  %v232_v28 = vand.u32 4294901760, %v2576_v7  ;;  %v239_v30 = vand.u32 4294901760, %v2578_v8  ;;  %v246_v31 = vand.u32 4294901760, %v2583_v10  ;;  %v253_v32 = vand.u32 4294901760, %v2585_v11 }
  0x3a   :  { %v2851_v33 = vand.u32 4294901760, %v2587_v14  ;;  %v2608_v34 = vpack.c.bf16 %v162_v49, %v155_v47  ;;  %v2612_v39 = vpack.c.bf16 %v176_v62, %v169_v50  ;;  %v2614_v40 = vpack.c.bf16 %v190_v20, %v183_v9 }
  0x3b   :  { %v2616_v42 = vpack.c.bf16 %v204_v23, %v197_v22  ;;  %v2618_v43 = vpack.c.bf16 %v218_v26, %v211_v25  ;;  %v2620_v44 = vpack.c.bf16 %v232_v28, %v225_v27  ;;  %v2622_v45 = vpack.c.bf16 %v246_v31, %v239_v30 }
  0x3c   :  { %2026 = vmatpush3.bf16.msra.mxu0 %v2525_v46  ;;  %2170 = vmatpush3.bf16.msra.mxu1 %v2525_v46  ;;  %v2628_v47 = vpack.c.bf16 %v2851_v33, %v253_v32  ;;  %v146_v49 = vand.u32 4294901760, %v145_v59  ;;  %v788_v56 = vand.u32 4294901760, %v787_v21  ;;  %v184_v50 = vsub.f32 %v2548_v57, %v183_v9 }
  0x3d   :  { %2027 = vmatprep.subr.bf16.mxu0 %v2406_v0  ;;  %2171 = vmatprep.subr.bf16.mxu1 %v2406_v0  ;;  %v191_v60 = vsub.f32 %v2551_v58, %v190_v20  ;;  %v2037_v62 = vpack.c.bf16 %v164_v16, %v157_v15  ;;  %v171_v63 = vand.u32 4294901760, %v2560_v61  ;;  %v178_v48 = vand.u32 4294901760, %v177_v17 }
  0x3e   :  { %v185_v59 = vand.u32 4294901760, %v184_v50  ;;  %v198_v20 = vsub.f32 %v2565_v2, %v197_v22  ;;  %v205_v33 = vsub.f32 %v2568_v3, %v204_v23  ;;  %v226_v17 = vsub.f32 %v2574_v6, %v225_v27 }
  0x3f   :  { %v192_v21 = vand.u32 4294901760, %v191_v60  ;;  %v2040_v9 = vpack.c.bf16 %v178_v48, %v171_v63  ;;  %v212_v48 = vsub.f32 %v2570_v4, %v211_v25  ;;  %v219_v63 = vsub.f32 %v2572_v5, %v218_v26 }
  0x40   :  { %2029 = vmatpush3.bf16.msra.mxu0 %v2538_v53  ;;  %2173 = vmatpush3.bf16.msra.mxu1 %v2538_v53  ;;  %v199_v15 = vand.u32 4294901760, %v198_v20  ;;  %v206_v16 = vand.u32 4294901760, %v205_v33  ;;  %v240_v25 = vsub.f32 %v2578_v8, %v239_v30  ;;  %v227_v33 = vand.u32 4294901760, %v226_v17 }
  0x41   :  { %2030 = vmatprep.subr.bf16.mxu0 %v2406_v0  ;;  %2174 = vmatprep.subr.bf16.mxu1 %v2406_v0  ;;  %v2043_v61 = vpack.c.bf16 %v192_v21, %v185_v59  ;;  %v213_v23 = vand.u32 4294901760, %v212_v48  ;;  %v247_v27 = vsub.f32 %v2583_v10, %v246_v31  ;;  %v254_v30 = vsub.f32 %v2585_v11, %v253_v32 }
  0x42   :  { %v2046_v22 = vpack.c.bf16 %v206_v16, %v199_v15  ;;  %v241_v60 = vand.u32 4294901760, %v240_v25  ;;  %v2852_v59 = vand.u32 4294901760, %v2587_v14  ;;  %v2064_v15 = vpack.c.bf16 %v2533_v51, %v2519_v38 }
  0x43   :  { %v2073_v38 = vpack.c.bf16 %v2572_v5, %v2570_v4  ;;  %v2076_v51 = vpack.c.bf16 %v2576_v7, %v2574_v6 }
  0x44   :  { %2032 = vmatpush3.bf16.msra.mxu0 %v2540_v54  ;;  %2176 = vmatpush3.bf16.msra.mxu1 %v2540_v54  ;;  %v261_v21 = vsub.f32 %v2587_v14, %v2852_v59 }
  0x45   :  { %2033 = vmatprep.subr.bf16.mxu0 %v2406_v0  ;;  %2177 = vmatprep.subr.bf16.mxu1 %v2406_v0 }
  0x46   :  { %v262_v20 = vand.u32 4294901760, %v261_v21 }
  0x48   :  { %2035 = vmatpush3.bf16.msra.mxu0 %v2542_v55  ;;  %2179 = vmatpush3.bf16.msra.mxu1 %v2542_v55 }
  0x49   :  { %2036 = vmatprep.subr.bf16.mxu0 %v2406_v0  ;;  %2180 = vmatprep.subr.bf16.mxu1 %v2406_v0 }
  0x4b   :  { %1625 = vmatmul.mubr.f32.vlgmr.msra.gmra.mrb[0].mxu0 %v146_v49  ;;  %1835 = vmatmul.mubr.f32.vlgmr.msra.gmra.mrb[0].mxu1 %v788_v56  ;;  %v220_v49 = vand.u32 4294901760, %v219_v63  ;;  %v233_v56 = vsub.f32 %v2576_v7, %v232_v28 }
  0x4c   :  { %2038 = vmatpush3.bf16.msra.mxu0 %v2037_v62  ;;  %2182 = vmatpush3.bf16.msra.mxu1 %v2037_v62  ;;  %v248_v62 = vand.u32 4294901760, %v247_v27 }
  0x4d   :  { %2039 = vmatprep.subr.bf16.mxu0 %v2406_v0  ;;  %2183 = vmatprep.subr.bf16.mxu1 %v2406_v0  ;;  %v2049_v26 = vpack.c.bf16 %v220_v49, %v213_v23  ;;  %v234_v50 = vand.u32 4294901760, %v233_v56 }
  0x4e   :  { %1659 = vmatprep.mubr.msk.f32.mxu0 %vm2407_vm0, %v2408_v1  ;;  %1869 = vmatprep.mubr.msk.f32.mxu1 %vm2407_vm0, %v2408_v1  ;;  %v2055_v31 = vpack.c.bf16 %v248_v62, %v241_v60 }
  0x4f   :  { %v2052_v28 = vpack.c.bf16 %v234_v50, %v227_v33 }
  0x50   :  { %2041 = vmatpush3.bf16.msra.mxu0 %v2040_v9  ;;  %2185 = vmatpush3.bf16.msra.mxu1 %v2040_v9  ;;  %v255_v9 = vand.u32 4294901760, %v254_v30 }
  0x51   :  { %2042 = vmatprep.subr.bf16.mxu0 %v2406_v0  ;;  %2186 = vmatprep.subr.bf16.mxu1 %v2406_v0 }
  0x52   :  { %v2058_v32 = vpack.c.bf16 %v262_v20, %v255_v9 }
  0x54   :  { %2044 = vmatpush3.bf16.msra.mxu0 %v2043_v61  ;;  %2188 = vmatpush3.bf16.msra.mxu1 %v2043_v61  ;;  %v2061_v61 = vpack.c.bf16 %v2517_v37, %v2509_v35  ;;  %v2067_v35 = vpack.c.bf16 %v2551_v58, %v2548_v57  ;;  %v2070_v37 = vpack.c.bf16 %v2568_v3, %v2565_v2  ;;  %v2853_v2 = vand.u32 4294901760, %v2515_v36 }
  0x55   :  { %2045 = vmatprep.subr.bf16.mxu0 %v2406_v0  ;;  %2189 = vmatprep.subr.bf16.mxu1 %v2406_v0  ;;  %v2079_v57 = vpack.c.bf16 %v2583_v10, %v2578_v8  ;;  %v2082_v58 = vpack.c.bf16 %v2587_v14, %v2585_v11  ;;  %v2854_v3 = vand.u32 4294901760, %v2536_v52 }
  0x58   :  { %2047 = vmatpush3.bf16.msra.mxu0 %v2046_v22  ;;  %2191 = vmatpush3.bf16.msra.mxu1 %v2046_v22 }
  0x59   :  { %2048 = vmatprep.subr.bf16.mxu0 %v2406_v0  ;;  %2192 = vmatprep.subr.bf16.mxu1 %v2406_v0 }
  0x5c   :  { %2050 = vmatpush3.bf16.msra.mxu0 %v2049_v26  ;;  %2194 = vmatpush3.bf16.msra.mxu1 %v2049_v26 }
  0x5d   :  { %2051 = vmatprep.subr.bf16.mxu0 %v2406_v0  ;;  %2195 = vmatprep.subr.bf16.mxu1 %v2406_v0 }
  0x60   :  { %2053 = vmatpush3.bf16.msra.mxu0 %v2052_v28  ;;  %2197 = vmatpush3.bf16.msra.mxu1 %v2052_v28 }
  0x61   :  { %2054 = vmatprep.subr.bf16.mxu0 %v2406_v0  ;;  %2198 = vmatprep.subr.bf16.mxu1 %v2406_v0 }
  0x64   :  { %2056 = vmatpush3.bf16.msra.mxu0 %v2055_v31  ;;  %2200 = vmatpush3.bf16.msra.mxu1 %v2055_v31 }
  0x65   :  { %2057 = vmatprep.subr.bf16.mxu0 %v2406_v0  ;;  %2201 = vmatprep.subr.bf16.mxu1 %v2406_v0 }
  0x68   :  { %2059 = vmatpush3.bf16.msra.mxu0 %v2058_v32  ;;  %2203 = vmatpush3.bf16.msra.mxu1 %v2058_v32 }
  0x69   :  { %2060 = vmatprep.subr.bf16.mxu0 %v2406_v0  ;;  %2204 = vmatprep.subr.bf16.mxu1 %v2406_v0 }
  0x6b   :  { %1660 = vmatmul.mubr.f32.vlgmr.msra.gmra.mrb[0].mxu0 %v2501_v24  ;;  %1870 = vmatmul.mubr.f32.vlgmr.msra.gmra.mrb[0].mxu1 %v2521_v41 }
  0x6c   :  { %2062 = vmatpush3.bf16.msra.mxu0 %v2061_v61  ;;  %2206 = vmatpush3.bf16.msra.mxu1 %v2061_v61 }
  0x6d   :  { %2063 = vmatprep.subr.bf16.mxu0 %v2406_v0  ;;  %2207 = vmatprep.subr.bf16.mxu1 %v2406_v0 }
  0x6e   :  { %1694 = vmatprep.mubr.msk.f32.mxu0 %vm2407_vm0, %v2408_v1  ;;  %1904 = vmatprep.mubr.msk.f32.mxu1 %vm2407_vm0, %v2408_v1 }
  0x70   :  { %2065 = vmatpush3.bf16.msra.mxu0 %v2064_v15  ;;  %2209 = vmatpush3.bf16.msra.mxu1 %v2064_v15 }
  0x71   :  { %2066 = vmatprep.subr.bf16.mxu0 %v2406_v0  ;;  %2210 = vmatprep.subr.bf16.mxu1 %v2406_v0 }
  0x74   :  { %2068 = vmatpush3.bf16.msra.mxu0 %v2067_v35  ;;  %2212 = vmatpush3.bf16.msra.mxu1 %v2067_v35 }
  0x75   :  { %2069 = vmatprep.subr.bf16.mxu0 %v2406_v0  ;;  %2213 = vmatprep.subr.bf16.mxu1 %v2406_v0 }
  0x78   :  { %2071 = vmatpush3.bf16.msra.mxu0 %v2070_v37  ;;  %2215 = vmatpush3.bf16.msra.mxu1 %v2070_v37 }
  0x79   :  { %2072 = vmatprep.subr.bf16.mxu0 %v2406_v0  ;;  %2216 = vmatprep.subr.bf16.mxu1 %v2406_v0 }
  0x7c   :  { %2074 = vmatpush3.bf16.msra.mxu0 %v2073_v38  ;;  %2218 = vmatpush3.bf16.msra.mxu1 %v2073_v38 }
  0x7d   :  { %2075 = vmatprep.subr.bf16.mxu0 %v2406_v0  ;;  %2219 = vmatprep.subr.bf16.mxu1 %v2406_v0 }
  0x80   :  { %2077 = vmatpush3.bf16.msra.mxu0 %v2076_v51  ;;  %2221 = vmatpush3.bf16.msra.mxu1 %v2076_v51 }
  0x81   :  { %2078 = vmatprep.subr.bf16.mxu0 %v2406_v0  ;;  %2222 = vmatprep.subr.bf16.mxu1 %v2406_v0 }
  0x84   :  { %2080 = vmatpush3.bf16.msra.mxu0 %v2079_v57  ;;  %2224 = vmatpush3.bf16.msra.mxu1 %v2079_v57 }
  0x85   :  { %2081 = vmatprep.subr.bf16.mxu0 %v2406_v0  ;;  %2225 = vmatprep.subr.bf16.mxu1 %v2406_v0 }
  0x88   :  { %2083 = vmatpush3.bf16.msra.mxu0 %v2082_v58  ;;  %2227 = vmatpush3.bf16.msra.mxu1 %v2082_v58 }
  0x89   :  { %2084 = vmatprep.subr.bf16.mxu0 %v2406_v0  ;;  %2228 = vmatprep.subr.bf16.mxu1 %v2406_v0 }
  0x8b   :  { %1695 = vmatmul.mubr.f32.vlgmr.msra.gmra.mrb[0].mxu0 %v2515_v36  ;;  %1905 = vmatmul.mubr.f32.vlgmr.msra.gmra.mrb[0].mxu1 %v2536_v52 }
  0x8c   :  { %2086 = vmatpush3.bf16.msra.mxu0 %v2476_v12  ;;  %2230 = vmatpush3.bf16.msra.mxu1 %v2476_v12 }
  0x8d   :  { %2087 = vmatprep.subr.bf16.mxu0 %v2406_v0  ;;  %2231 = vmatprep.subr.bf16.mxu1 %v2406_v0 }
  0x8e   :  { %1729 = vmatprep.mubr.msk.f32.mxu0 %vm2407_vm0, %v2408_v1  ;;  %1939 = vmatprep.mubr.msk.f32.mxu1 %vm2407_vm0, %v2408_v1 }
  0x90   :  { %2089 = vmatpush3.bf16.msra.mxu0 %v2480_v13  ;;  %2233 = vmatpush3.bf16.msra.mxu1 %v2480_v13 }
  0x91   :  { %2090 = vmatprep.subr.bf16.mxu0 %v2406_v0  ;;  %2234 = vmatprep.subr.bf16.mxu1 %v2406_v0 }
  0x94   :  { %2092 = vmatpush3.bf16.msra.mxu0 %v2494_v19  ;;  %2236 = vmatpush3.bf16.msra.mxu1 %v2494_v19 }
  0x95   :  { %2093 = vmatprep.subr.bf16.mxu0 %v2406_v0  ;;  %2237 = vmatprep.subr.bf16.mxu1 %v2406_v0 }
  0x98   :  { %2095 = vmatpush3.bf16.msra.mxu0 %v2507_v29  ;;  %2239 = vmatpush3.bf16.msra.mxu1 %v2507_v29 }
  0x99   :  { %2096 = vmatprep.subr.bf16.mxu0 %v2406_v0  ;;  %2240 = vmatprep.subr.bf16.mxu1 %v2406_v0 }
  0x9c   :  { %2098 = vmatpush3.bf16.msra.mxu0 %v2525_v46  ;;  %2242 = vmatpush3.bf16.msra.mxu1 %v2525_v46 }
  0x9d   :  { %2099 = vmatprep.subr.bf16.mxu0 %v2406_v0  ;;  %2243 = vmatprep.subr.bf16.mxu1 %v2406_v0 }
  0xa0   :  { %2101 = vmatpush3.bf16.msra.mxu0 %v2538_v53  ;;  %2245 = vmatpush3.bf16.msra.mxu1 %v2538_v53 }
  0xa1   :  { %2102 = vmatprep.subr.bf16.mxu0 %v2406_v0  ;;  %2246 = vmatprep.subr.bf16.mxu1 %v2406_v0 }
  0xa4   :  { %2104 = vmatpush3.bf16.msra.mxu0 %v2540_v54  ;;  %2248 = vmatpush3.bf16.msra.mxu1 %v2540_v54 }
  0xa5   :  { %2105 = vmatprep.subr.bf16.mxu0 %v2406_v0  ;;  %2249 = vmatprep.subr.bf16.mxu1 %v2406_v0 }
  0xa8   :  { %2107 = vmatpush3.bf16.msra.mxu0 %v2542_v55  ;;  %2251 = vmatpush3.bf16.msra.mxu1 %v2542_v55 }
  0xa9   :  { %2108 = vmatprep.subr.bf16.mxu0 %v2406_v0  ;;  %2252 = vmatprep.subr.bf16.mxu1 %v2406_v0 }
  0xab   :  { %1730 = vmatmul.mubr.f32.vlgmr.msra.gmra.mrb[0].mxu0 %v2853_v2  ;;  %1940 = vmatmul.mubr.f32.vlgmr.msra.gmra.mrb[0].mxu1 %v2854_v3 }
  0xac   :  { %2110 = vmatpush3.bf16.msra.mxu0 %v2608_v34  ;;  %2254 = vmatpush3.bf16.msra.mxu1 %v2608_v34 }
  0xad   :  { %2111 = vmatprep.subr.bf16.mxu0 %v2406_v0  ;;  %2255 = vmatprep.subr.bf16.mxu1 %v2406_v0 }
  0xae   :  { %1764 = vmatprep.mubr.msk.f32.mxu0 %vm2407_vm0, %v2408_v1  ;;  %1974 = vmatprep.mubr.msk.f32.mxu1 %vm2407_vm0, %v2408_v1 }
  0xb0   :  { %2113 = vmatpush3.bf16.msra.mxu0 %v2612_v39  ;;  %2257 = vmatpush3.bf16.msra.mxu1 %v2612_v39 }
  0xb1   :  { %2114 = vmatprep.subr.bf16.mxu0 %v2406_v0  ;;  %2258 = vmatprep.subr.bf16.mxu1 %v2406_v0 }
  0xb4   :  { %2116 = vmatpush3.bf16.msra.mxu0 %v2614_v40  ;;  %2260 = vmatpush3.bf16.msra.mxu1 %v2614_v40 }
  0xb5   :  { %2117 = vmatprep.subr.bf16.mxu0 %v2406_v0  ;;  %2261 = vmatprep.subr.bf16.mxu1 %v2406_v0 }
  0xb8   :  { %2119 = vmatpush3.bf16.msra.mxu0 %v2616_v42  ;;  %2263 = vmatpush3.bf16.msra.mxu1 %v2616_v42 }
  0xb9   :  { %2120 = vmatprep.subr.bf16.mxu0 %v2406_v0  ;;  %2264 = vmatprep.subr.bf16.mxu1 %v2406_v0 }
  0xbc   :  { %2122 = vmatpush3.bf16.msra.mxu0 %v2618_v43  ;;  %2266 = vmatpush3.bf16.msra.mxu1 %v2618_v43 }
  0xbd   :  { %2123 = vmatprep.subr.bf16.mxu0 %v2406_v0  ;;  %2267 = vmatprep.subr.bf16.mxu1 %v2406_v0 }
  0xc0   :  { %2125 = vmatpush3.bf16.msra.mxu0 %v2620_v44  ;;  %2269 = vmatpush3.bf16.msra.mxu1 %v2620_v44 }
  0xc1   :  { %2126 = vmatprep.subr.bf16.mxu0 %v2406_v0  ;;  %2270 = vmatprep.subr.bf16.mxu1 %v2406_v0 }
  0xc4   :  { %2128 = vmatpush3.bf16.msra.mxu0 %v2622_v45  ;;  %2272 = vmatpush3.bf16.msra.mxu1 %v2622_v45 }
  0xc5   :  { %2129 = vmatprep.subr.bf16.mxu0 %v2406_v0  ;;  %2273 = vmatprep.subr.bf16.mxu1 %v2406_v0 }
  0xc8   :  { %2131 = vmatpush3.bf16.msra.mxu0 %v2628_v47  ;;  %2275 = vmatpush3.bf16.msra.mxu1 %v2628_v47 }
  0xc9   :  { %2132 = vmatprep.subr.bf16.mxu0 %v2406_v0  ;;  %2276 = vmatprep.subr.bf16.mxu1 %v2406_v0 }
  0xcb   :  { %1765 = vmatmul.mubr.f32.vlgmr.msra.gmra.mrb[0].mxu0 %v2501_v24  ;;  %1975 = vmatmul.mubr.f32.vlgmr.msra.gmra.mrb[0].mxu1 %v2521_v41 }
  0xcc   :  { %2134 = vmatpush3.bf16.msra.mxu0 %v2476_v12  ;;  %2278 = vmatpush3.bf16.msra.mxu1 %v2476_v12 }
  0xcd   :  { %2135 = vmatprep.subr.bf16.mxu0 %v2406_v0  ;;  %2279 = vmatprep.subr.bf16.mxu1 %v2406_v0 }
  0xce   :  { %1799 = vmatprep.mubr.msk.f32.mxu0 %vm2407_vm0, %v2408_v1  ;;  %2009 = vmatprep.mubr.msk.f32.mxu1 %vm2407_vm0, %v2408_v1 }
  0xd0   :  { %2137 = vmatpush3.bf16.msra.mxu0 %v2480_v13  ;;  %2281 = vmatpush3.bf16.msra.mxu1 %v2480_v13 }
  0xd1   :  { %2138 = vmatprep.subr.bf16.mxu0 %v2406_v0  ;;  %2282 = vmatprep.subr.bf16.mxu1 %v2406_v0 }
  0xd4   :  { %2140 = vmatpush3.bf16.msra.mxu0 %v2494_v19  ;;  %2284 = vmatpush3.bf16.msra.mxu1 %v2494_v19 }
  0xd5   :  { %2141 = vmatprep.subr.bf16.mxu0 %v2406_v0  ;;  %2285 = vmatprep.subr.bf16.mxu1 %v2406_v0 }
  0xd8   :  { %2143 = vmatpush3.bf16.msra.mxu0 %v2507_v29  ;;  %2287 = vmatpush3.bf16.msra.mxu1 %v2507_v29 }
  0xd9   :  { %2144 = vmatprep.subr.bf16.mxu0 %v2406_v0  ;;  %2288 = vmatprep.subr.bf16.mxu1 %v2406_v0 }
  0xdc   :  { %2146 = vmatpush3.bf16.msra.mxu0 %v2525_v46  ;;  %2290 = vmatpush3.bf16.msra.mxu1 %v2525_v46 }
  0xdd   :  { %2147 = vmatprep.subr.bf16.mxu0 %v2406_v0  ;;  %2291 = vmatprep.subr.bf16.mxu1 %v2406_v0 }
  0xe0   :  { %2149 = vmatpush3.bf16.msra.mxu0 %v2538_v53  ;;  %2293 = vmatpush3.bf16.msra.mxu1 %v2538_v53 }
  0xe1   :  { %2150 = vmatprep.subr.bf16.mxu0 %v2406_v0  ;;  %2294 = vmatprep.subr.bf16.mxu1 %v2406_v0 }
  0xe4   :  { %2152 = vmatpush3.bf16.msra.mxu0 %v2540_v54  ;;  %2296 = vmatpush3.bf16.msra.mxu1 %v2540_v54 }
  0xe5   :  { %2153 = vmatprep.subr.bf16.mxu0 %v2406_v0  ;;  %2297 = vmatprep.subr.bf16.mxu1 %v2406_v0 }
  0xe8   :  { %2155 = vmatpush3.bf16.msra.mxu0 %v2542_v55  ;;  %2299 = vmatpush3.bf16.msra.mxu1 %v2542_v55 }
  0xeb   :  { %1800 = vmatmul.mubr.f32.vlgmr.msra.gmra.mrb[0].mxu0 %v2501_v24  ;;  %2010 = vmatmul.mubr.f32.vlgmr.msra.gmra.mrb[0].mxu1 %v2521_v41  ;;  %v1386_v24 = vld [vmem:[%s2845_s1] ss:$0 sm:$0xff] }
  0xec   :  { %v1387_v41 = vld [vmem:[%s2846_s2] ss:$0 sm:$0xff] }
 0x1be   :  { %v698_v1 = vpop.f32.mrb[0].mxu0  ;;  %v1340_v12 = vpop.f32.mrb[0].mxu1 }
 0x1bf   :  { %v1344_v13 = vmul.f32 0.03125, %v698_v1  ;;  %v1801_v19 = vpop.f32.mrb[1].mxu0  ;;  %v2011_v29 = vpop.f32.mrb[1].mxu1  ;;  %v1345_v46 = vmul.f32 0.03125, %v1340_v12 }
 0x1c1   :  { %v1346_v36 = vmul.f32 %v1344_v13, %v1344_v13  ;;  %v1353_v0 = vsub.f32 %v2490_v18, %v1344_v13 }
 0x1c3   :  { %v1347_v52 = vsub.f32 %v1345_v46, %v1346_v36 }
 0x1c5   :  { %v1348_v53 = vmax.f32 %v1347_v52, 0.0 }
 0x1c7   :  { %v1349_v54 = vadd.f32 1e-05, %v1348_v53 }
 0x1c9   :  { %2328 = vrsqrt.f32 %v1349_v54 }
 0x1d3   :  { %v2329_v4 = vpop.eup %2328 }
 0x1d4   :  { %v1354_v55 = vmul.f32 %v2329_v4, %v1353_v0 }
 0x1d6   :  { %v1361_v5 = vmul.f32 %v1386_v24, %v1354_v55 }
 0x1d8   :  { %v1368_v6 = vadd.f32 %v1387_v41, %v1361_v5 }
 0x1da   :  { %1369 = vst [vmem:[#allocation7] sm:$0xf] %v1368_v6 }
 0x1db   :  { %2385 = shalt.err (!%p2382_p6)
}
 0x1dc   :  { %s2386_s21 = scalar_lea.hbm %s2848_s4, 64 }
 0x1dd   :  { %p2387_p7 = scmp.ne.s32.totalorder %s2848_s4, %s2386_s21  ;;  %p2390_p8 = scmp.lt.u32.totalorder %s2386_s21, %s2848_s4 }
 0x1df   :  { %p2392_p9 = pnand %p2390_p8, %p2387_p7 }
 0x1e1   :  { %2395 = shalt.err (!%p2392_p9)
}
 0x1e2   :  { %1379 = dma.vmem_to_hbm [thread:$0]  %s1377_s18, 64, %s2848_s4, [#allocation4]  }
 0x1e3   :  { %2400 = dma.done.wait [#allocation4], 64  }
 0x1e4   :  { %2401 = vsyncadd [#allocation4], 4294967232 }
 0x1e5   :  { %1383 = vsyncpa [#allocation3], 1 }
 0x1e6   :  { %1384 = vsyncpa [#allocation6], 1 }
 0x1e7   :  { %1385 = vsyncpa [#allocation4], 1 }

</bundles_post_ra>
